<compile_context>
chip_gen: v5e
topology: v5e:2x2
jax: 0.10.0
libtpu: 0.0.40
codegen_flags: <defaults>
</compile_context>

<pallas_src>
import functools

import jax
import jax.numpy as jnp
from jax.experimental import pallas as pl
from jax.experimental.pallas import tpu as pltpu

LANES = 128
SUBLANES = 8
DEFAULT_TILE_ROWS = 1024  # 1024 x 128 f32 = 512 KiB per input per pipeline buffer


def _charbonnier_partial_kernel(pred_ref, tgt_ref, out_ref, *,
                                eps, n_elem, tile_rows, inner, need_mask):
    """Accumulates per-chunk vreg-shaped partial sums of sqrt((p-t)^2 + eps)."""
    c = pl.program_id(0)   # parallel chunk axis (maps to TCs on v7x)
    i = pl.program_id(1)   # sequential reduction axis

    @pl.when(i == 0)
    def _():
        out_ref[...] = jnp.zeros_like(out_ref)

    d = pred_ref[...].astype(jnp.float32) - tgt_ref[...].astype(jnp.float32)
    val = jnp.sqrt(d * d + jnp.float32(eps))

    if need_mask:
        # Mask lane padding / the ragged last block (static Python flag, so
        # the fast exactly-divisible path emits no mask at all).
        # int32 index math: assumes < 2**31 elements.
        blk = c * inner + i
        row = jax.lax.broadcasted_iota(jnp.int32, (tile_rows, LANES), 0)
        lane = jax.lax.broadcasted_iota(jnp.int32, (tile_rows, LANES), 1)
        gidx = (blk * tile_rows + row) * LANES + lane
        val = jnp.where(gidx < n_elem, val, jnp.float32(0.0))

    # vreg-shaped partial sums: pure VPU vector adds on the per-step path;
    # the cross-lane/sublane reduce happens once, in the wrapper.
    out_ref[...] += val.reshape(tile_rows // SUBLANES, SUBLANES, LANES).sum(axis=0)


def charbonnier_loss(pred, target, loss_weight=1.0, reduction="mean",
                     eps=1e-12, tile_rows=DEFAULT_TILE_ROWS):
    """Charbonnier loss over NCHW tensors (weight=None path)."""
    assert pred.shape == target.shape
    if reduction not in ("none", "mean", "sum"):
        raise ValueError(f"Unsupported reduction mode: {reduction}.")

    if reduction == "none":
        # TODO(synk): 'none' reduction is a pure elementwise map; kept in JAX.
        return loss_weight * jnp.sqrt(
            (pred.astype(jnp.float32) - target.astype(jnp.float32)) ** 2 + eps)

    n_elem = pred.size
    pred_flat = pred.reshape(-1)
    tgt_flat = target.reshape(-1)

    # Only pad when numel is not a multiple of 8*128 (pad of < 1024 elems);
    # for typical NCHW tensors this branch is never taken, so no extra HBM
    # copy of pred/target is emitted. Padded elements are masked in-kernel.
    blk_elems = SUBLANES * LANES
    padded = ((n_elem + blk_elems - 1) // blk_elems) * blk_elems
    if padded != n_elem:
        # TODO(synk): a ragged 1-D BlockSpec could avoid even this small-pad
        # copy; only triggers when numel % 1024 != 0.
        pred_flat = jnp.pad(pred_flat, (0, padded - n_elem))
        tgt_flat = jnp.pad(tgt_flat, (0, padded - n_elem))

    rows = padded // LANES                       # multiple of 8
    tile_rows = min(tile_rows, rows)             # stays a multiple of 8
    pred2d = pred_flat.reshape(rows, LANES)      # free contiguous reshape
    tgt2d = tgt_flat.reshape(rows, LANES)

    row_blocks = pl.cdiv(rows, tile_rows)
    # Two parallel chunks -> both TensorCores on v7x; a size-1 outer loop
    # otherwise. Only split when it divides evenly so no block is fully OOB.
    num_chunks = 2 if (row_blocks >= 2 and row_blocks % 2 == 0) else 1
    inner = row_blocks // num_chunks
    need_mask = (num_chunks * inner * tile_rows * LANES) != n_elem

    tile_spec = pl.BlockSpec((tile_rows, LANES), lambda c, i: (c * inner + i, 0))
    out_spec = pl.BlockSpec((SUBLANES, LANES), lambda c, i: (c, 0))

    partials = pl.pallas_call(
        functools.partial(
            _charbonnier_partial_kernel,
            eps=eps, n_elem=n_elem, tile_rows=tile_rows,
            inner=inner, need_mask=need_mask),
        out_shape=jax.ShapeDtypeStruct((num_chunks * SUBLANES, LANES), jnp.float32),
        grid_spec=pltpu.PrefetchScalarGridSpec(
            num_scalar_prefetch=0,
            grid=(num_chunks, inner),
            in_specs=[tile_spec, tile_spec],
            out_specs=out_spec,
        ),
        compiler_params=pltpu.CompilerParams(
            dimension_semantics=("parallel", "arbitrary"),
        ),
    )(pred2d, tgt2d)

    total = jnp.sum(partials)
    if reduction == "mean":
        total = total / jnp.float32(n_elem)
    return jnp.float32(loss_weight) * total


class CharbonnierLoss:
    """JAX/Pallas port of mmweather CharbonnierLoss (forward only)."""

    def __init__(self, loss_weight=1.0, reduction="mean", sample_wise=False,
                 eps=1e-12):
        if reduction not in ["none", "mean", "sum"]:
            raise ValueError(f"Unsupported reduction mode: {reduction}.")
        self.loss_weight = loss_weight
        self.reduction = reduction
        self.sample_wise = sample_wise  # only matters when weight is not None
        self.eps = eps

    def __call__(self, pred, target, weight=None):
        # TODO(synk): element-wise `weight` path (masked_loss with sample_wise)
        # not implemented; default forward (weight=None) is exact.
        assert weight is None, "weight path not implemented in this kernel"
        return charbonnier_loss(
            pred, target,
            loss_weight=self.loss_weight,
            reduction=self.reduction,
            eps=self.eps,
        )


def _ref_loss(pred, target, eps, reduction):
    v = jnp.sqrt((pred.astype(jnp.float32) - target.astype(jnp.float32)) ** 2 + eps)
    if reduction == "mean":
        return jnp.mean(v)
    if reduction == "sum":
        return jnp.sum(v)
    return v


if __name__ == "__main__":
    key = jax.random.PRNGKey(0)

    # Primary small NCHW shape (matches the module's expected layout).
    N, C, H, W = 2, 4, 16, 16
    k1, k2 = jax.random.split(key)
    pred = jax.random.normal(k1, (N, C, H, W), dtype=jnp.float32)
    target = jax.random.normal(k2, (N, C, H, W), dtype=jnp.float32)

    loss_mod = CharbonnierLoss(loss_weight=1.0, reduction="mean", eps=1e-12)
    out = jax.block_until_ready(loss_mod(pred, target))
    ref = _ref_loss(pred, target, 1e-12, "mean")
    assert jnp.allclose(out, ref, rtol=1e-5, atol=1e-6), (out, ref)

    # 'sum' reduction + loss_weight check on the same shape.
    loss_sum = CharbonnierLoss(loss_weight=0.5, reduction="sum", eps=1e-12)
    out_s = jax.block_until_ready(loss_sum(pred, target))
    ref_s = 0.5 * _ref_loss(pred, target, 1e-12, "sum")
    assert jnp.allclose(out_s, ref_s, rtol=1e-5, atol=1e-5), (out_s, ref_s)

    # Ragged shape (numel % 1024 != 0) -> exercises pad + in-kernel tail mask.
    k3, k4 = jax.random.split(k1)
    pred_r = jax.random.normal(k3, (2, 3, 17, 19), dtype=jnp.float32)
    target_r = jax.random.normal(k4, (2, 3, 17, 19), dtype=jnp.float32)
    out_r = jax.block_until_ready(loss_mod(pred_r, target_r))
    ref_r = _ref_loss(pred_r, target_r, 1e-12, "mean")
    assert jnp.allclose(out_r, ref_r, rtol=1e-5, atol=1e-6), (out_r, ref_r)

    # Larger shape -> exercises multi-block grid + 2-chunk parallel split.
    k5, k6 = jax.random.split(k2)
    pred_b = jax.random.normal(k5, (4, 8, 128, 128), dtype=jnp.float32)
    target_b = jax.random.normal(k6, (4, 8, 128, 128), dtype=jnp.float32)
    out_b = jax.block_until_ready(loss_mod(pred_b, target_b))
    ref_b = _ref_loss(pred_b, target_b, 1e-12, "mean")
    assert jnp.allclose(out_b, ref_b, rtol=1e-4, atol=1e-6), (out_b, ref_b)

    print("KERNEL_OK")
</pallas_src>

<mosaic_0001>
module attributes {stable_mosaic.version = 11 : i64} {
  func.func @_charbonnier_partial_kernel(%arg0: i32, %arg1: i32, %arg2: memref<16x128xf32, #tpu.memory_space<vmem>>, %arg3: memref<16x128xf32, #tpu.memory_space<vmem>>, %arg4: memref<8x128xf32, #tpu.memory_space<vmem>>) attributes {dimension_semantics = [#tpu.dimension_semantics<parallel>, #tpu.dimension_semantics<arbitrary>], iteration_bounds = array<i64: 1, 1>, scalar_prefetch = 0 : i64, scratch_operands = 0 : i64, tpu.core_type = #tpu.core_type<tc>, window_params = [{transform_indices = @transform_0, window_bounds = array<i64: 16, 128>}, {transform_indices = @transform_1, window_bounds = array<i64: 16, 128>}, {transform_indices = @transform_2, window_bounds = array<i64: 8, 128>}]} {
    %c0_i32 = arith.constant 0 : i32
    %0 = arith.cmpi eq, %arg1, %c0_i32 : i32
    %1 = arith.extui %0 : i1 to i32
    %c0_i32_0 = arith.constant 0 : i32
    %2 = arith.cmpi ne, %1, %c0_i32_0 : i32
    scf.if %2 {
      %cst_9 = arith.constant 0.000000e+00 : f32
      %15 = vector.broadcast %cst_9 : f32 to vector<8x128xf32>
      %c0_10 = arith.constant 0 : index
      %c0_11 = arith.constant 0 : index
      %16 = vector.load %arg4[%c0_10, %c0_11] : memref<8x128xf32, #tpu.memory_space<vmem>>, vector<8x128xf32>
      tpu.vector_store %arg4[%c0_10, %c0_11], %15 {strides = array<i32>} : memref<8x128xf32, #tpu.memory_space<vmem>>, vector<8x128xf32>,
    } else {
    }
    %c0 = arith.constant 0 : index
    %c0_1 = arith.constant 0 : index
    %3 = vector.load %arg2[%c0, %c0_1] : memref<16x128xf32, #tpu.memory_space<vmem>>, vector<16x128xf32>
    %c0_2 = arith.constant 0 : index
    %c0_3 = arith.constant 0 : index
    %4 = vector.load %arg3[%c0_2, %c0_3] : memref<16x128xf32, #tpu.memory_space<vmem>>, vector<16x128xf32>
    %5 = arith.subf %3, %4 : vector<16x128xf32>
    %6 = arith.mulf %5, %5 : vector<16x128xf32>
    %cst = arith.constant 9.99999996E-13 : f32
    %7 = vector.broadcast %cst : f32 to vector<16x128xf32>
    %8 = arith.addf %6, %7 : vector<16x128xf32>
    %9 = math.sqrt %8 : vector<16x128xf32>
    %c0_4 = arith.constant 0 : index
    %c0_5 = arith.constant 0 : index
    %10 = vector.load %arg4[%c0_4, %c0_5] : memref<8x128xf32, #tpu.memory_space<vmem>>, vector<8x128xf32>
    %11 = vector.shape_cast %9 : vector<16x128xf32> to vector<2x8x128xf32>
    %cst_6 = arith.constant dense<0.000000e+00> : vector<8x128xf32>
    %12 = vector.multi_reduction <add>, %11, %cst_6 [0] : vector<2x8x128xf32> to vector<8x128xf32>
    %13 = arith.addf %10, %12 : vector<8x128xf32>
    %c0_7 = arith.constant 0 : index
    %c0_8 = arith.constant 0 : index
    %14 = vector.load %arg4[%c0_7, %c0_8] : memref<8x128xf32, #tpu.memory_space<vmem>>, vector<8x128xf32>
    tpu.vector_store %arg4[%c0_7, %c0_8], %13 {strides = array<i32>} : memref<8x128xf32, #tpu.memory_space<vmem>>, vector<8x128xf32>,
    return
  }
  func.func @transform_0(%arg0: i32, %arg1: i32) -> (i32, i32) {
    %c1_i32 = arith.constant 1 : i32
    %0 = arith.muli %arg0, %c1_i32 : i32
    %1 = arith.addi %0, %arg1 : i32
    %c0_i32 = arith.constant 0 : i32
    %c0_i32_0 = arith.constant 0 : i32
    return %1, %c0_i32 : i32, i32
  }
  func.func @transform_1(%arg0: i32, %arg1: i32) -> (i32, i32) {
    %c1_i32 = arith.constant 1 : i32
    %0 = arith.muli %arg0, %c1_i32 : i32
    %1 = arith.addi %0, %arg1 : i32
    %c0_i32 = arith.constant 0 : i32
    %c0_i32_0 = arith.constant 0 : i32
    return %1, %c0_i32 : i32, i32
  }
  func.func @transform_2(%arg0: i32, %arg1: i32) -> (i32, i32) {
    %c0_i32 = arith.constant 0 : i32
    %c0_i32_0 = arith.constant 0 : i32
    return %arg0, %c0_i32 : i32, i32
  }
}

</mosaic_0001>

<bundles_post_ra>
// kernel: tpu_custom_call.1
= control target key start
LH: loop header
LB: loop body
LE: loop exit
PB: predicated region body
PF: predicated region fallthrough
CT: control target
= control target key end

     0   :  { %7 = vsyncpa [#allocation3], 0  ;;  %s234_s0 = inlined_call_operand.hbm [shape: f32[16,128], index: 0, kind: input, shape index: {}]   ;;  %s235_s1 = inlined_call_operand.hbm [shape: f32[16,128], index: 1, kind: input, shape index: {}]   ;;  %s236_s2 = inlined_call_operand.hbm [shape: f32[8,128], index: 2, kind: output, shape index: {}]  }
   0x1   :  { %8 = vsyncpa [#allocation6], 0 }
   0x2   :  { %9 = vsyncpa [#allocation4], 0  ;;  %s18_s11 = sshll.u32 %s234_s0, 4  ;;  %s205_s12 = smov [#allocation2]   ;;  %s19_s11 = int_to_ptr.hbm [resolvable:$true] %s18_s11 }
   0x3   :  { %s20_s13 = sshll.u32 %s205_s12, 4  ;;  %s35_s16 = sshll.u32 %s235_s1, 4  ;;  %s21_s13 = int_to_ptr.vmem [resolvable:$true] %s20_s13  ;;  %s36_s16 = int_to_ptr.hbm [resolvable:$true] %s35_s16 }
   0x4   :  { %s206_s17 = smov 128   ;;  %s207_s18 = smov 8  }
   0x5   :  { %26 = dma.hbm_to_vmem [thread:$0]  %s19_s11, 256, %s21_s13, [#allocation3], %s206_s17, %s206_s17, %s207_s18  }
   0x6   :  { %s208_s19 = smov [#allocation5]  }
   0x7   :  { %s37_s20 = sshll.u32 %s208_s19, 4  ;;  %s38_s20 = int_to_ptr.vmem [resolvable:$true] %s37_s20 }
   0x8   :  { %43 = dma.hbm_to_vmem [thread:$0]  %s36_s16, 256, %s38_s20, [#allocation6], %s206_s17, %s206_s17, %s207_s18  }
   0x9   :  { %199 = dma.done.wait [#allocation3], 256  }
   0xa   :  { %200 = vsyncadd [#allocation3], 4294967040 }
   0xb   :  { %201 = dma.done.wait [#allocation6], 256  }
   0xc   :  { %202 = vsyncadd [#allocation6], 4294967040  ;;  %v61_v0 = vld [vmem:[#allocation2] sm:$0xff]  ;;  %v62_v1 = vld [vmem:[#allocation2 + $0x8] sm:$0xff]  ;;  %s209_s0 = smov [#allocation7]   ;;  %s106_s23 = sshll.u32 %s236_s2, 4  ;;  %s107_s23 = int_to_ptr.hbm [resolvable:$true] %s106_s23 }
   0xd   :  { %v63_v2 = vld [vmem:[#allocation5] sm:$0xff]  ;;  %v64_v3 = vld [vmem:[#allocation5 + $0x8] sm:$0xff]  ;;  %s104_s1 = sshll.u32 %s209_s0, 4  ;;  %s105_s1 = int_to_ptr.vmem [resolvable:$true] %s104_s1 }
   0xe   :  { %v65_v4 = vsub.f32 %v61_v0, %v63_v2  ;;  %v66_v5 = vsub.f32 %v62_v1, %v64_v3 }
  0x10   :  { %v67_v6 = vmul.f32 %v65_v4, %v65_v4  ;;  %v68_v7 = vmul.f32 %v66_v5, %v66_v5 }
  0x12   :  { %v69_v8 = vadd.f32 1e-12, %v67_v6  ;;  %v70_v9 = vadd.f32 1e-12, %v68_v7 }
  0x14   :  { %123 = vrsqrt.f32 %v69_v8  ;;  %vm78_vm0 = vcmp.eq.f32.partialorder %v69_v8, inf  ;;  %v81_v21 = vand.u32 2147483648, %v69_v8  ;;  %vm80_vm1 = vcmp.eq.f32.partialorder %v69_v8, 0.0 }
  0x15   :  { %125 = vrsqrt.f32 %v70_v9  ;;  %vm90_vm2 = vcmp.eq.f32.partialorder %v70_v9, inf  ;;  %v93_v24 = vand.u32 2147483648, %v70_v9  ;;  %vm92_vm3 = vcmp.eq.f32.partialorder %v70_v9, 0.0 }
  0x1a   :  { %v124_v10 = vpop.eup %123 }
  0x1b   :  { %v126_v11 = vpop.eup %125  ;;  %v72_v12 = vmul.f32 %v124_v10, %v69_v8 }
  0x1c   :  { %v84_v13 = vmul.f32 %v126_v11, %v70_v9 }
  0x1d   :  { %v73_v14 = vmul.f32 %v124_v10, %v72_v12 }
  0x1e   :  { %v85_v15 = vmul.f32 %v126_v11, %v84_v13 }
  0x1f   :  { %v74_v16 = vmul.f32 0.5, %v73_v14 }
  0x20   :  { %v86_v17 = vmul.f32 0.5, %v85_v15 }
  0x21   :  { %v75_v18 = vsub.f32 1.5, %v74_v16 }
  0x22   :  { %v87_v19 = vsub.f32 1.5, %v86_v17 }
  0x23   :  { %v76_v20 = vmul.f32 %v124_v10, %v75_v18 }
  0x24   :  { %v88_v22 = vmul.f32 %v126_v11, %v87_v19 }
  0x25   :  { %v77_v23 = vmul.f32 %v76_v20, %v69_v8 }
  0x26   :  { %v89_v25 = vmul.f32 %v88_v22, %v70_v9 }
  0x27   :  { %v79_v26 = vsel %vm78_vm0, %v69_v8, %v77_v23 }
  0x28   :  { %v82_v27 = vsel %vm80_vm1, %v81_v21, %v79_v26  ;;  %v91_v28 = vsel %vm90_vm2, %v70_v9, %v89_v25 }
  0x29   :  { %v94_v29 = vsel %vm92_vm3, %v93_v24, %v91_v28 }
  0x2a   :  { %v96_v30 = vadd.f32 %v94_v29, %v82_v27 }
  0x2c   :  { %98 = vst [vmem:[#allocation7] sm:$0xff] %v96_v30 }
  0x2d   :  { %109 = dma.vmem_to_hbm [thread:$0]  %s105_s1, 128, %s107_s23, [#allocation4]  }
  0x2e   :  { %203 = dma.done.wait [#allocation4], 128  }
  0x2f   :  { %204 = vsyncadd [#allocation4], 4294967168 }
  0x30   :  { %114 = vsyncpa [#allocation3], 1 }
  0x31   :  { %115 = vsyncpa [#allocation6], 1 }
  0x32   :  { %116 = vsyncpa [#allocation4], 1 }

</bundles_post_ra>
